<compile_context>
chip_gen: v7x
topology: tpu7x:2x2x1
jax: 0.10.0
libtpu: 0.0.40
codegen_flags: <defaults>
</compile_context>

<pallas_src>
import jax
import jax.numpy as jnp
from jax.experimental import pallas as pl
from jax.experimental.pallas import tpu as pltpu


# ---------------------------------------------------------------------------
# Tile selection helpers
# ---------------------------------------------------------------------------

_TM_CAP = 512                        # one M block for typical batch sizes
_N_TILE_CANDIDATES = (512, 256, 128)  # prefer 256-multiples (v6e/v7x MXU 2x256^2)
_K_TILE_CANDIDATES = (4096, 2048, 1024, 512, 256, 128)
_VMEM_TILE_BUDGET = 48 << 20         # fits v7x's 64 MiB physical with headroom
_PALLAS_MIN_WORK = 1 << 24           # below this, launch/DMA overhead dominates


def _round_up(x, m):
    return (x + m - 1) // m * m


def _largest_divisor_tile(dim, candidates):
    for c in candidates:
        if c <= dim and dim % c == 0:
            return c
    return None


def _vmem_need(tm, tn, tk, in_bytes, out_bytes):
    return (2 * tm * tk * in_bytes      # double-buffered x tile
            + 2 * tk * tn * in_bytes    # double-buffered W tile
            + 2 * tm * tn * out_bytes   # double-buffered output tile
            + tm * tn * 4               # f32 accumulator scratch
            + 2 * tn * 4)               # double-buffered bias tile


def _pick_tk(K, tm, tn, in_bytes, out_bytes, budget):
    # Prefer full K (fewer accumulator RMW passes / pipeline steps), but cap at
    # 4096 for very large K per the v7x VMEM re-budgeting guidance.
    candidates = ([K] if K <= 4096 else []) + [c for c in _K_TILE_CANDIDATES if c < K]
    for cand in candidates:
        if K % cand:
            continue
        if _vmem_need(tm, tn, cand, in_bytes, out_bytes) <= budget:
            return cand
    return 128 if K % 128 == 0 else None


def _grid_semantics(grid_m, grid_n):
    """Pick per-axis dimension semantics; engage both v7x TensorCores."""
    m_sem = pltpu.PARALLEL
    n_sem = pltpu.PARALLEL
    try:
        kind = jax.devices()[0].device_kind.lower()
    except Exception:
        kind = ""
    if "v7" in kind:
        # Plain PARALLEL does not shard across v7x's two TensorCores;
        # CORE_PARALLEL does.  Put it on the first axis with extent > 1.
        if grid_m > 1:
            m_sem = pltpu.CORE_PARALLEL
        elif grid_n > 1:
            n_sem = pltpu.CORE_PARALLEL
    return m_sem, n_sem


# ---------------------------------------------------------------------------
# Kernels
# ---------------------------------------------------------------------------

def _linear_kernel_single_k(x_ref, w_ref, b_ref, o_ref):
    # Whole K fits in one step: no accumulator scratch, write straight out.
    o_ref[...] = (
        jnp.dot(x_ref[...], w_ref[...], preferred_element_type=jnp.float32)
        + b_ref[...]
    ).astype(o_ref.dtype)


def _linear_kernel_multi_k(x_ref, w_ref, b_ref, o_ref, acc_ref):
    k = pl.program_id(2)

    @pl.when(k == 0)
    def _():
        acc_ref[...] = jnp.zeros_like(acc_ref)

    # MXU matmul, f32 accumulation in VMEM scratch.
    acc_ref[...] += jnp.dot(
        x_ref[...], w_ref[...], preferred_element_type=jnp.float32
    )

    @pl.when(k == pl.num_programs(2) - 1)
    def _():
        # Bias add + downcast epilogue kept in f32 (v5e VPU has no bf16).
        o_ref[...] = (acc_ref[...] + b_ref[...]).astype(o_ref.dtype)


# ---------------------------------------------------------------------------
# Wrapper
# ---------------------------------------------------------------------------

def linear_pallas(x, w, b, *, out_dtype=jnp.float32, tm=None, tn=None, tk=None,
                  weight_buffers=2, vmem_budget=_VMEM_TILE_BUDGET):
    """out = x @ w + b   (x: [M,K], w: [K,N] pre-cast, b: [1,N] f32)."""
    M, K = x.shape
    Kw, N = w.shape
    assert Kw == K, "weight must be (input_dim, embed_dim)"
    assert b.shape == (1, N)
    assert N % 128 == 0 and K % 128 == 0, (
        "Pallas path expects lane-dense K/N (multiples of 128); "
        "use simple_module_forward() for ragged shapes.")

    # Cast the activation to the (pre-cast) weight dtype; W is never cast here.
    if x.dtype != w.dtype:
        x = x.astype(w.dtype)

    in_bytes = jnp.dtype(w.dtype).itemsize
    out_bytes = jnp.dtype(out_dtype).itemsize

    # tm: one M block for typical batches -> W streamed from HBM exactly once.
    # bf16 packs 2 rows/sublane, so align tm to 16 when compute dtype is 2-byte.
    m_align = 16 if in_bytes == 2 else (32 if in_bytes == 1 else 8)
    if tm is None:
        tm = min(_TM_CAP, _round_up(M, m_align))
    if tn is None:
        tn = _largest_divisor_tile(N, _N_TILE_CANDIDATES)
        assert tn is not None
    else:
        assert N % tn == 0 and tn % 128 == 0
    if tk is None:
        tk = _pick_tk(K, tm, tn, in_bytes, out_bytes, vmem_budget)
        assert tk is not None
    else:
        assert K % tk == 0 and tk % 128 == 0

    # Explicit VMEM budget (v7x default scoped limit is lower than v5e/v6e).
    need = _vmem_need(tm, tn, tk, in_bytes, out_bytes)
    vmem_limit = int(min(64 << 20, max(need + (4 << 20), 32 << 20)))

    # Only M is padded (cheap); K/N are never padded and the output is never
    # sliced on N.
    Mp = _round_up(M, tm)
    if Mp != M:
        x = jnp.pad(x, ((0, Mp - M), (0, 0)))

    grid_m, grid_n, grid_k = Mp // tm, N // tn, K // tk
    m_sem, n_sem = _grid_semantics(grid_m, grid_n)

    w_pipeline = {}
    if weight_buffers > 2:
        # v7x: deeper buffering on the weight stream if DMA is exposed.
        w_pipeline["pipeline_mode"] = pl.Buffered(weight_buffers)

    if grid_k == 1:
        out = pl.pallas_call(
            _linear_kernel_single_k,
            out_shape=jax.ShapeDtypeStruct((Mp, N), out_dtype),
            grid_spec=pltpu.PrefetchScalarGridSpec(
                num_scalar_prefetch=0,
                grid=(grid_m, grid_n),
                in_specs=[
                    pl.BlockSpec((tm, tk), lambda i, j: (i, 0)),
                    pl.BlockSpec((tk, tn), lambda i, j: (0, j), **w_pipeline),
                    pl.BlockSpec((1, tn), lambda i, j: (0, j)),
                ],
                out_specs=pl.BlockSpec((tm, tn), lambda i, j: (i, j)),
            ),
            compiler_params=pltpu.CompilerParams(
                dimension_semantics=(m_sem, n_sem),
                vmem_limit_bytes=vmem_limit,
            ),
        )(x, w, b)
    else:
        out = pl.pallas_call(
            _linear_kernel_multi_k,
            out_shape=jax.ShapeDtypeStruct((Mp, N), out_dtype),
            grid_spec=pltpu.PrefetchScalarGridSpec(
                num_scalar_prefetch=0,
                grid=(grid_m, grid_n, grid_k),
                in_specs=[
                    pl.BlockSpec((tm, tk), lambda i, j, k: (i, k)),
                    pl.BlockSpec((tk, tn), lambda i, j, k: (k, j), **w_pipeline),
                    pl.BlockSpec((1, tn), lambda i, j, k: (0, j)),
                ],
                out_specs=pl.BlockSpec((tm, tn), lambda i, j, k: (i, j)),
                scratch_shapes=[pltpu.VMEM((tm, tn), jnp.float32)],
            ),
            compiler_params=pltpu.CompilerParams(
                dimension_semantics=(m_sem, n_sem, pltpu.ARBITRARY),
                vmem_limit_bytes=vmem_limit,
            ),
        )(x, w, b)

    if Mp != M:
        out = out[:M]
    return out


def simple_module_forward(x, w, b, *, out_dtype=jnp.float32, force_pallas=False,
                          **kwargs):
    """SimpleModule.forward: tiny / ragged problems go to fused XLA."""
    M, K = x.shape
    N = w.shape[1]
    lane_dense = (N % 128 == 0) and (K % 128 == 0)
    if (not force_pallas and M * N * K < _PALLAS_MIN_WORK) or not lane_dense:
        return (x.astype(jnp.float32) @ w.astype(jnp.float32)
                + b.astype(jnp.float32)).astype(out_dtype)
    return linear_pallas(x, w, b, out_dtype=out_dtype, **kwargs)


class SimpleModuleJax:
    """JAX/Pallas port of SimpleModule: parameters prepared once.

    w_t is W.T with shape (input_dim, embed_dim); it is cast to the MXU
    compute dtype (bf16 by default) exactly once here, not per forward call.
    """

    def __init__(self, w_t, b, *, compute_dtype=jnp.bfloat16,
                 out_dtype=jnp.float32):
        K, N = w_t.shape
        self.w = w_t.astype(compute_dtype) if compute_dtype is not None else w_t
        self.b = jnp.asarray(b, jnp.float32).reshape(1, N)
        self.out_dtype = out_dtype

    def __call__(self, x, **kwargs):
        return simple_module_forward(x, self.w, self.b,
                                     out_dtype=self.out_dtype, **kwargs)


# ---------------------------------------------------------------------------
# Demo / correctness checks
# ---------------------------------------------------------------------------

if __name__ == "__main__":
    # Small but lane-dense shapes: batch=16, K=N=256 (multiples of 128).
    batch, input_dim, embed_dim = 16, 256, 256

    key = jax.random.PRNGKey(0)
    kx, kw, kb = jax.random.split(key, 3)

    # Deterministic PyTorch nn.Linear-style uniform init.
    bound = 1.0 / (input_dim ** 0.5)
    w_t = jax.random.uniform(kw, (input_dim, embed_dim), jnp.float32, -bound, bound)
    b = jax.random.uniform(kb, (1, embed_dim), jnp.float32, -bound, bound)
    x = jax.random.normal(kx, (batch, input_dim), jnp.float32)

    ref = x @ w_t + b

    # f32 compute path (tight tolerance): auto tiles give a single K step, so
    # the scratch-free kernel is used.
    mod_f32 = SimpleModuleJax(w_t, b, compute_dtype=None)
    out_f32 = mod_f32(x, force_pallas=True)
    jax.block_until_ready(out_f32)
    assert out_f32.shape == (batch, embed_dim)
    assert jnp.allclose(out_f32, ref, atol=1e-5, rtol=1e-5)

    # Default bf16 MXU path (weights pre-cast once at module construction,
    # f32 accumulation + f32 bias-add epilogue): looser tolerance.
    mod = SimpleModuleJax(w_t, b)
    out_bf16 = mod(x, force_pallas=True)
    jax.block_until_ready(out_bf16)
    assert out_bf16.dtype == jnp.float32
    assert jnp.allclose(out_bf16, ref, atol=2e-2, rtol=2e-2)

    # Force small tiles to exercise the multi-K accumulator kernel
    # (grid = (1, 2, 2): two N tiles, two K accumulation steps).
    out_multi = mod(x, force_pallas=True, tn=128, tk=128)
    jax.block_until_ready(out_multi)
    assert jnp.allclose(out_multi, ref, atol=2e-2, rtol=2e-2)

    # Tiny / ragged problems dispatch to the fused XLA op (no pad/slice passes).
    small = simple_module_forward(x[:8, :32], w_t[:32, :32], b[:, :32])
    jax.block_until_ready(small)
    assert jnp.allclose(small, x[:8, :32] @ w_t[:32, :32] + b[:, :32],
                        atol=1e-5, rtol=1e-5)

    print("KERNEL_OK")
</pallas_src>

<mosaic_0001>
module attributes {stable_mosaic.version = 11 : i64} {
  func.func @_linear_kernel_single_k(%arg0: i32, %arg1: i32, %arg2: memref<16x256xf32, #tpu.memory_space<vmem>>, %arg3: memref<256x256xf32, #tpu.memory_space<vmem>>, %arg4: memref<1x256xf32, #tpu.memory_space<vmem>>, %arg5: memref<16x256xf32, #tpu.memory_space<vmem>>) attributes {dimension_semantics = [#tpu.dimension_semantics<parallel>, #tpu.dimension_semantics<parallel>], iteration_bounds = array<i64: 1, 1>, scalar_prefetch = 0 : i64, scratch_operands = 0 : i64, tpu.core_type = #tpu.core_type<tc>, window_params = [{transform_indices = @transform_0, window_bounds = array<i64: 16, 256>}, {transform_indices = @transform_1, window_bounds = array<i64: 256, 256>}, {transform_indices = @transform_2, window_bounds = array<i64: 1, 256>}, {transform_indices = @transform_3, window_bounds = array<i64: 16, 256>}]} {
    %c0 = arith.constant 0 : index
    %c0_0 = arith.constant 0 : index
    %0 = vector.load %arg2[%c0, %c0_0] : memref<16x256xf32, #tpu.memory_space<vmem>>, vector<16x256xf32>
    %c0_1 = arith.constant 0 : index
    %c0_2 = arith.constant 0 : index
    %1 = vector.load %arg3[%c0_1, %c0_2] : memref<256x256xf32, #tpu.memory_space<vmem>>, vector<256x256xf32>
    %cst = arith.constant dense<0.000000e+00> : vector<16x256xf32>
    %2 = tpu.matmul %0, %1, %cst {dimension_numbers = #tpu.dot_dimension_numbers<[1], [0], [0], [1], [0, 0, 1, 1], [], []>} : vector<16x256xf32>, vector<256x256xf32>, vector<16x256xf32> -> vector<16x256xf32>
    %c0_3 = arith.constant 0 : index
    %c0_4 = arith.constant 0 : index
    %3 = vector.load %arg4[%c0_3, %c0_4] : memref<1x256xf32, #tpu.memory_space<vmem>>, vector<1x256xf32>
    %4 = vector.broadcast %3 : vector<1x256xf32> to vector<16x256xf32>
    %5 = arith.addf %2, %4 : vector<16x256xf32>
    %c0_5 = arith.constant 0 : index
    %c0_6 = arith.constant 0 : index
    %6 = vector.load %arg5[%c0_5, %c0_6] : memref<16x256xf32, #tpu.memory_space<vmem>>, vector<16x256xf32>
    tpu.vector_store %arg5[%c0_5, %c0_6], %5 {strides = array<i32>} : memref<16x256xf32, #tpu.memory_space<vmem>>, vector<16x256xf32>,
    return
  }
  func.func @transform_0(%arg0: i32, %arg1: i32) -> (i32, i32) {
    %c0_i32 = arith.constant 0 : i32
    %c0_i32_0 = arith.constant 0 : i32
    return %arg0, %c0_i32 : i32, i32
  }
  func.func @transform_1(%arg0: i32, %arg1: i32) -> (i32, i32) {
    %c0_i32 = arith.constant 0 : i32
    %c0_i32_0 = arith.constant 0 : i32
    return %c0_i32, %arg1 : i32, i32
  }
  func.func @transform_2(%arg0: i32, %arg1: i32) -> (i32, i32) {
    %c0_i32 = arith.constant 0 : i32
    %c0_i32_0 = arith.constant 0 : i32
    return %c0_i32, %arg1 : i32, i32
  }
  func.func @transform_3(%arg0: i32, %arg1: i32) -> (i32, i32) {
    %c0_i32 = arith.constant 0 : i32
    return %arg0, %arg1 : i32, i32
  }
}

</mosaic_0001>

<bundles_post_ra>
// kernel: tpu_custom_call.1
= control target key start
LH: loop header
LB: loop body
LE: loop exit
PB: predicated region body
PF: predicated region fallthrough
CT: control target
= control target key end

     0   :  { %8 = vsyncpa [#allocation3], 0  ;;  %s468_s0 = inlined_call_operand.hbm [shape: f32[16,256], index: 0, kind: input, shape index: {}]   ;;  %s469_s1 = inlined_call_operand.hbm [shape: f32[256,256], index: 1, kind: input, shape index: {}]   ;;  %s470_s2 = inlined_call_operand.vmem [shape: f32[1,256], index: 2, kind: input, shape index: {}]   ;;  %s471_s3 = inlined_call_operand.hbm [shape: f32[16,256], index: 3, kind: output, shape index: {}]  }
   0x1   :  { %9 = vsyncpa [#allocation6], 0 }
   0x2   :  { %10 = vsyncpa [#allocation4], 0  ;;  %s395_s12 = smov [#allocation2]   ;;  %s323_s16 = scalar_lea.hbm %s468_s0, 512 }
   0x3   :  { %s16_s13 = sshll.u32 %s395_s12, 4  ;;  %p324_p0 = scmp.ne.s32.totalorder %s468_s0, %s323_s16  ;;  %s17_s13 = int_to_ptr.vmem [resolvable:$true] %s16_s13 }
   0x4   :  { %p327_p1 = scmp.lt.u32.totalorder %s323_s16, %s468_s0 }
   0x6   :  { %p329_p2 = pnand %p327_p1, %p324_p0 }
   0x8   :  { %332 = shalt.err (!%p329_p2)
}
   0x9   :  { %s333_s21 = scalar_lea.vmem %s17_s13, 512  ;;  %p338_p4 = scmp.lt.s32.totalorder %s17_s13, %s17_s13 }
   0xa   :  { %p334_p3 = scmp.ne.s32.totalorder %s17_s13, %s333_s21  ;;  %p339_p5 = scmp.lt.s32.totalorder %s333_s21, %s333_s21 }
   0xc   :  { %p340_p6 = por %p339_p5, %p338_p4 }
   0xe   :  { %p341_p7 = pnand %p340_p6, %p334_p3 }
  0x10   :  { %344 = shalt.err (!%p341_p7)
}
  0x11   :  { %s396_s22 = smov 256   ;;  %s397_s23 = smov 16  }
  0x12   :  { %22 = dma.hbm_to_vmem [thread:$0]  %s468_s0, 512, %s17_s13, [#allocation3], %s396_s22, %s396_s22, %s397_s23  }
  0x13   :  { %s398_s26 = smov [#allocation5]   ;;  %s345_s30 = scalar_lea.hbm %s469_s1, 8192 }
  0x14   :  { %s28_s27 = sshll.u32 %s398_s26, 4  ;;  %p346_p8 = scmp.ne.s32.totalorder %s469_s1, %s345_s30  ;;  %s29_s27 = int_to_ptr.vmem [resolvable:$true] %s28_s27 }
  0x15   :  { %p349_p9 = scmp.lt.u32.totalorder %s345_s30, %s469_s1 }
  0x17   :  { %p351_p10 = pnand %p349_p9, %p346_p8 }
  0x19   :  { %354 = shalt.err (!%p351_p10)
}
  0x1a   :  { %s355_s8 = scalar_lea.vmem %s29_s27, 8192  ;;  %p360_p12 = scmp.lt.s32.totalorder %s29_s27, %s29_s27 }
  0x1b   :  { %p356_p11 = scmp.ne.s32.totalorder %s29_s27, %s355_s8  ;;  %p361_p13 = scmp.lt.s32.totalorder %s355_s8, %s355_s8 }
  0x1d   :  { %p362_p0 = por %p361_p13, %p360_p12 }
  0x1f   :  { %p363_p1 = pnand %p362_p0, %p356_p11 }
  0x21   :  { %366 = shalt.err (!%p363_p1)
}
  0x22   :  { %34 = dma.hbm_to_vmem [thread:$0]  %s469_s1, 8192, %s29_s27, [#allocation6], %s396_s22, %s396_s22, %s397_s23  }
  0x23   :  { %389 = dma.done.wait [#allocation3], 512  }
  0x24   :  { %390 = vsyncadd [#allocation3], 4294966784 }
  0x25   :  { %391 = dma.done.wait [#allocation6], 8192  }
  0x26   :  { %392 = vsyncadd [#allocation6], 4294959104  ;;  %v48_v0 = vld [vmem:[#allocation5 + $0x8] sm:$0xff]  ;;  %v50_v1 = vld [vmem:[#allocation5 + $0x18] sm:$0xff]  ;;  %s399_s11 = smov [#allocation7]  }
  0x27   :  { %v47_v2 = vld [vmem:[#allocation5] sm:$0xff]  ;;  %v222_v3 = vpack.c.bf16 %v50_v1, %v48_v0  ;;  %v49_v4 = vld [vmem:[#allocation5 + $0x10] sm:$0xff]  ;;  %v52_v5 = vld [vmem:[#allocation5 + $0x28] sm:$0xff]  ;;  %s209_s12 = sshll.u32 %s399_s11, 4  ;;  %s210_s12 = int_to_ptr.vmem [resolvable:$true] %s209_s12 }
  0x28   :  { %v54_v6 = vld [vmem:[#allocation5 + $0x38] sm:$0xff]  ;;  %v224_v7 = vpack.c.bf16 %v49_v4, %v47_v2  ;;  %v51_v9 = vld [vmem:[#allocation5 + $0x20] sm:$0xff]  ;;  %v53_v10 = vld [vmem:[#allocation5 + $0x30] sm:$0xff]  ;;  %s367_s13 = scalar_lea.vmem %s210_s12, 512  ;;  %p372_p3 = scmp.lt.s32.totalorder %s210_s12, %s210_s12 }
  0x29   :  { %v226_v8 = vpack.c.bf16 %v54_v6, %v52_v5  ;;  %v56_v11 = vld [vmem:[#allocation5 + $0x48] sm:$0xff]  ;;  %223 = vmatprep.subr.bf16.mxu0 %v222_v3  ;;  %286 = vmatprep.subr.bf16.mxu1 %v222_v3  ;;  %v58_v12 = vld [vmem:[#allocation5 + $0x58] sm:$0xff]  ;;  %v228_v13 = vpack.c.bf16 %v53_v10, %v51_v9  ;;  %v55_v15 = vld [vmem:[#allocation5 + $0x40] sm:$0xff]  ;;  %p368_p2 = scmp.ne.s32.totalorder %s210_s12, %s367_s13  ;;  %p373_p4 = scmp.lt.s32.totalorder %s367_s13, %s367_s13 }
  0x2a   :  { %225 = vmatpush1.bf16.msra.mxu0 %v224_v7  ;;  %302 = vmatpush1.bf16.msra.mxu1 %v224_v7  ;;  %v230_v14 = vpack.c.bf16 %v58_v12, %v56_v11  ;;  %v57_v16 = vld [vmem:[#allocation5 + $0x50] sm:$0xff]  ;;  %v60_v17 = vld [vmem:[#allocation5 + $0x68] sm:$0xff]  ;;  %v62_v18 = vld [vmem:[#allocation5 + $0x78] sm:$0xff] }
  0x2b   :  { %227 = vmatprep.subr.bf16.mxu0 %v226_v8  ;;  %287 = vmatprep.subr.bf16.mxu1 %v226_v8  ;;  %v232_v19 = vpack.c.bf16 %v57_v16, %v55_v15  ;;  %v234_v20 = vpack.c.bf16 %v62_v18, %v60_v17  ;;  %v59_v21 = vld [vmem:[#allocation5 + $0x60] sm:$0xff]  ;;  %v61_v22 = vld [vmem:[#allocation5 + $0x70] sm:$0xff]  ;;  %v64_v23 = vld [vmem:[#allocation5 + $0x88] sm:$0xff]  ;;  %p374_p5 = por %p373_p4, %p372_p3 }
  0x2c   :  { %v66_v24 = vld [vmem:[#allocation5 + $0x98] sm:$0xff]  ;;  %v236_v25 = vpack.c.bf16 %v61_v22, %v59_v21  ;;  %v63_v27 = vld [vmem:[#allocation5 + $0x80] sm:$0xff]  ;;  %v65_v28 = vld [vmem:[#allocation5 + $0x90] sm:$0xff] }
  0x2d   :  { %v238_v26 = vpack.c.bf16 %v66_v24, %v64_v23  ;;  %v68_v29 = vld [vmem:[#allocation5 + $0xa8] sm:$0xff]  ;;  %v70_v30 = vld [vmem:[#allocation5 + $0xb8] sm:$0xff]  ;;  %v240_v31 = vpack.c.bf16 %v65_v28, %v63_v27  ;;  %v67_v33 = vld [vmem:[#allocation5 + $0xa0] sm:$0xff]  ;;  %p375_p6 = pnand %p374_p5, %p368_p2 }
  0x2e   :  { %229 = vmatpush1.bf16.msra.mxu0 %v228_v13  ;;  %303 = vmatpush1.bf16.msra.mxu1 %v228_v13  ;;  %v242_v32 = vpack.c.bf16 %v70_v30, %v68_v29  ;;  %v69_v34 = vld [vmem:[#allocation5 + $0xb0] sm:$0xff]  ;;  %v72_v35 = vld [vmem:[#allocation5 + $0xc8] sm:$0xff]  ;;  %v74_v36 = vld [vmem:[#allocation5 + $0xd8] sm:$0xff] }
  0x2f   :  { %231 = vmatprep.subr.bf16.mxu0 %v230_v14  ;;  %288 = vmatprep.subr.bf16.mxu1 %v230_v14  ;;  %v244_v37 = vpack.c.bf16 %v69_v34, %v67_v33  ;;  %v71_v38 = vld [vmem:[#allocation5 + $0xc0] sm:$0xff]  ;;  %v246_v39 = vpack.c.bf16 %v74_v36, %v72_v35  ;;  %v73_v40 = vld [vmem:[#allocation5 + $0xd0] sm:$0xff]  ;;  %v44_v41 = vld [vmem:[#allocation2 + $0x8] sm:$0xff]  ;;  %v113_v36 = vlaneseq }
  0x30   :  { %v46_v42 = vld [vmem:[#allocation2 + $0x18] sm:$0xff]  ;;  %v76_v43 = vld [vmem:[#allocation5 + $0xe8] sm:$0xff]  ;;  %187 = vmatprep.mubr.f32.mxu0 %v44_v41  ;;  %v248_v45 = vpack.c.bf16 %v73_v40, %v71_v38  ;;  %v75_v47 = vld [vmem:[#allocation5 + $0xe0] sm:$0xff] }
  0x31   :  { %v78_v44 = vld [vmem:[#allocation5 + $0xf8] sm:$0xff]  ;;  %193 = vmatprep.mubr.f32.mxu1 %v46_v42  ;;  %v77_v48 = vld [vmem:[#allocation5 + $0xf0] sm:$0xff]  ;;  %v80_v49 = vld [vmem:[#allocation5 + $0x108] sm:$0xff] }
  0x32   :  { %233 = vmatpush1.bf16.msra.mxu0 %v232_v19  ;;  %304 = vmatpush1.bf16.msra.mxu1 %v232_v19  ;;  %v250_v46 = vpack.c.bf16 %v78_v44, %v76_v43  ;;  %v82_v50 = vld [vmem:[#allocation5 + $0x118] sm:$0xff]  ;;  %v252_v51 = vpack.c.bf16 %v77_v48, %v75_v47  ;;  %v79_v53 = vld [vmem:[#allocation5 + $0x100] sm:$0xff]  ;;  %v81_v54 = vld [vmem:[#allocation5 + $0x110] sm:$0xff] }
  0x33   :  { %235 = vmatprep.subr.bf16.mxu0 %v234_v20  ;;  %289 = vmatprep.subr.bf16.mxu1 %v234_v20  ;;  %v254_v52 = vpack.c.bf16 %v82_v50, %v80_v49  ;;  %v84_v55 = vld [vmem:[#allocation5 + $0x128] sm:$0xff]  ;;  %v86_v56 = vld [vmem:[#allocation5 + $0x138] sm:$0xff]  ;;  %v256_v57 = vpack.c.bf16 %v81_v54, %v79_v53  ;;  %v83_v59 = vld [vmem:[#allocation5 + $0x120] sm:$0xff] }
  0x34   :  { %v258_v58 = vpack.c.bf16 %v86_v56, %v84_v55  ;;  %v85_v60 = vld [vmem:[#allocation5 + $0x130] sm:$0xff]  ;;  %v88_v61 = vld [vmem:[#allocation5 + $0x148] sm:$0xff]  ;;  %v90_v62 = vld [vmem:[#allocation5 + $0x158] sm:$0xff] }
  0x35   :  { %v260_v63 = vpack.c.bf16 %v85_v60, %v83_v59  ;;  %v262_v0 = vpack.c.bf16 %v90_v62, %v88_v61  ;;  %v87_v1 = vld [vmem:[#allocation5 + $0x140] sm:$0xff]  ;;  %v89_v2 = vld [vmem:[#allocation5 + $0x150] sm:$0xff]  ;;  %v92_v3 = vld [vmem:[#allocation5 + $0x168] sm:$0xff] }
  0x36   :  { %237 = vmatpush1.bf16.msra.mxu0 %v236_v25  ;;  %305 = vmatpush1.bf16.msra.mxu1 %v236_v25  ;;  %v94_v4 = vld [vmem:[#allocation5 + $0x178] sm:$0xff]  ;;  %v264_v5 = vpack.c.bf16 %v89_v2, %v87_v1  ;;  %v91_v7 = vld [vmem:[#allocation5 + $0x160] sm:$0xff]  ;;  %v93_v8 = vld [vmem:[#allocation5 + $0x170] sm:$0xff] }
  0x37   :  { %239 = vmatprep.subr.bf16.mxu0 %v238_v26  ;;  %290 = vmatprep.subr.bf16.mxu1 %v238_v26  ;;  %v266_v6 = vpack.c.bf16 %v94_v4, %v92_v3  ;;  %v96_v9 = vld [vmem:[#allocation5 + $0x188] sm:$0xff]  ;;  %v98_v10 = vld [vmem:[#allocation5 + $0x198] sm:$0xff]  ;;  %v268_v11 = vpack.c.bf16 %v93_v8, %v91_v7  ;;  %v95_v13 = vld [vmem:[#allocation5 + $0x180] sm:$0xff] }
  0x38   :  { %v270_v12 = vpack.c.bf16 %v98_v10, %v96_v9  ;;  %v97_v14 = vld [vmem:[#allocation5 + $0x190] sm:$0xff]  ;;  %v100_v15 = vld [vmem:[#allocation5 + $0x1a8] sm:$0xff]  ;;  %v102_v16 = vld [vmem:[#allocation5 + $0x1b8] sm:$0xff] }
  0x39   :  { %v272_v17 = vpack.c.bf16 %v97_v14, %v95_v13  ;;  %v274_v18 = vpack.c.bf16 %v102_v16, %v100_v15  ;;  %v99_v19 = vld [vmem:[#allocation5 + $0x1a0] sm:$0xff]  ;;  %v101_v20 = vld [vmem:[#allocation5 + $0x1b0] sm:$0xff]  ;;  %v104_v21 = vld [vmem:[#allocation5 + $0x1c8] sm:$0xff] }
  0x3a   :  { %241 = vmatpush1.bf16.msra.mxu0 %v240_v31  ;;  %306 = vmatpush1.bf16.msra.mxu1 %v240_v31  ;;  %v106_v22 = vld [vmem:[#allocation5 + $0x1d8] sm:$0xff]  ;;  %v276_v23 = vpack.c.bf16 %v101_v20, %v99_v19  ;;  %v103_v25 = vld [vmem:[#allocation5 + $0x1c0] sm:$0xff]  ;;  %v105_v26 = vld [vmem:[#allocation5 + $0x1d0] sm:$0xff] }
  0x3b   :  { %243 = vmatprep.subr.bf16.mxu0 %v242_v32  ;;  %291 = vmatprep.subr.bf16.mxu1 %v242_v32  ;;  %v278_v24 = vpack.c.bf16 %v106_v22, %v104_v21  ;;  %v108_v27 = vld [vmem:[#allocation5 + $0x1e8] sm:$0xff]  ;;  %v110_v28 = vld [vmem:[#allocation5 + $0x1f8] sm:$0xff]  ;;  %v280_v29 = vpack.c.bf16 %v105_v26, %v103_v25  ;;  %v107_v31 = vld [vmem:[#allocation5 + $0x1e0] sm:$0xff] }
  0x3c   :  { %v282_v30 = vpack.c.bf16 %v110_v28, %v108_v27  ;;  %v109_v32 = vld [vmem:[#allocation5 + $0x1f0] sm:$0xff]  ;;  %v43_v34 = vld [vmem:[#allocation2] sm:$0xff] }
  0x3d   :  { %v284_v33 = vpack.c.bf16 %v109_v32, %v107_v31  ;;  %v45_v35 = vld [vmem:[#allocation2 + $0x10] sm:$0xff] }
  0x3e   :  { %245 = vmatpush1.bf16.msra.mxu0 %v244_v37  ;;  %307 = vmatpush1.bf16.msra.mxu1 %v244_v37  ;;  %v114_v37 = vshrl.u32 %v113_v36, 7 }
  0x3f   :  { %247 = vmatprep.subr.bf16.mxu0 %v246_v39  ;;  %292 = vmatprep.subr.bf16.mxu1 %v246_v39  ;;  %v111_v39 = vld [vmem:[%s470_s2] sm:$0x3] }
  0x40   :  { %v115_v38 = vsub.s32 0, %v114_v37  ;;  %v119_v40 = vsub.s32 1, %v114_v37 }
  0x42   :  { %249 = vmatpush1.bf16.msra.mxu0 %v248_v45  ;;  %308 = vmatpush1.bf16.msra.mxu1 %v248_v45  ;;  %v116_v41 = vrot.slane %v111_v39, %v115_v38  ;;  %v120_v42 = vrot.slane %v111_v39, %v119_v40 }
  0x43   :  { %251 = vmatprep.subr.bf16.mxu0 %v250_v46  ;;  %293 = vmatprep.subr.bf16.mxu1 %v250_v46 }
  0x46   :  { %253 = vmatpush1.bf16.msra.mxu0 %v252_v51  ;;  %309 = vmatpush1.bf16.msra.mxu1 %v252_v51 }
  0x47   :  { %255 = vmatprep.subr.bf16.mxu0 %v254_v52  ;;  %294 = vmatprep.subr.bf16.mxu1 %v254_v52 }
  0x4a   :  { %257 = vmatpush1.bf16.msra.mxu0 %v256_v57  ;;  %310 = vmatpush1.bf16.msra.mxu1 %v256_v57 }
  0x4b   :  { %259 = vmatprep.subr.bf16.mxu0 %v258_v58  ;;  %295 = vmatprep.subr.bf16.mxu1 %v258_v58 }
  0x4e   :  { %261 = vmatpush1.bf16.msra.mxu0 %v260_v63  ;;  %311 = vmatpush1.bf16.msra.mxu1 %v260_v63 }
  0x4f   :  { %263 = vmatprep.subr.bf16.mxu0 %v262_v0  ;;  %296 = vmatprep.subr.bf16.mxu1 %v262_v0 }
  0x52   :  { %265 = vmatpush1.bf16.msra.mxu0 %v264_v5  ;;  %312 = vmatpush1.bf16.msra.mxu1 %v264_v5 }
  0x53   :  { %267 = vmatprep.subr.bf16.mxu0 %v266_v6  ;;  %297 = vmatprep.subr.bf16.mxu1 %v266_v6 }
  0x56   :  { %269 = vmatpush1.bf16.msra.mxu0 %v268_v11  ;;  %313 = vmatpush1.bf16.msra.mxu1 %v268_v11 }
  0x57   :  { %271 = vmatprep.subr.bf16.mxu0 %v270_v12  ;;  %298 = vmatprep.subr.bf16.mxu1 %v270_v12 }
  0x5a   :  { %273 = vmatpush1.bf16.msra.mxu0 %v272_v17  ;;  %314 = vmatpush1.bf16.msra.mxu1 %v272_v17 }
  0x5b   :  { %275 = vmatprep.subr.bf16.mxu0 %v274_v18  ;;  %299 = vmatprep.subr.bf16.mxu1 %v274_v18 }
  0x5e   :  { %277 = vmatpush1.bf16.msra.mxu0 %v276_v23  ;;  %315 = vmatpush1.bf16.msra.mxu1 %v276_v23 }
  0x5f   :  { %279 = vmatprep.subr.bf16.mxu0 %v278_v24  ;;  %300 = vmatprep.subr.bf16.mxu1 %v278_v24 }
  0x62   :  { %281 = vmatpush1.bf16.msra.mxu0 %v280_v29  ;;  %316 = vmatpush1.bf16.msra.mxu1 %v280_v29 }
  0x63   :  { %283 = vmatprep.subr.bf16.mxu0 %v282_v30  ;;  %301 = vmatprep.subr.bf16.mxu1 %v282_v30 }
  0x66   :  { %285 = vmatpush1.bf16.msra.mxu0 %v284_v33  ;;  %317 = vmatpush1.bf16.msra.mxu1 %v284_v33 }
  0x69   :  { %188 = vmatmul.mubr.f32.vlgmr.msra.gmra.mrb[0].mxu0 %v43_v34  ;;  %194 = vmatmul.mubr.f32.vlgmr.msra.gmra.mrb[0].mxu1 %v45_v35 }
 0x13c   :  { %v189_v43 = vpop.f32.mrb[0].mxu0  ;;  %v195_v44 = vpop.f32.mrb[0].mxu1 }
 0x13d   :  { %v190_v45 = vadd.f32 %v189_v43, %v116_v41  ;;  %v196_v46 = vadd.f32 %v195_v44, %v116_v41  ;;  %v191_v47 = vpop.f32.mrb[1].mxu0  ;;  %v197_v48 = vpop.f32.mrb[1].mxu1 }
 0x13e   :  { %v192_v49 = vadd.f32 %v191_v47, %v120_v42  ;;  %v198_v50 = vadd.f32 %v197_v48, %v120_v42 }
 0x13f   :  { %200 = vst [vmem:[#allocation7] sm:$0xff] %v190_v45  ;;  %202 = vst [vmem:[#allocation7 + $0x10] sm:$0xff] %v196_v46 }
 0x140   :  { %201 = vst [vmem:[#allocation7 + $0x8] sm:$0xff] %v192_v49  ;;  %203 = vst [vmem:[#allocation7 + $0x18] sm:$0xff] %v198_v50 }
 0x141   :  { %378 = shalt.err (!%p375_p6)
}
 0x142   :  { %s379_s15 = scalar_lea.hbm %s471_s3, 512 }
 0x143   :  { %p380_p7 = scmp.ne.s32.totalorder %s471_s3, %s379_s15  ;;  %p383_p8 = scmp.lt.u32.totalorder %s379_s15, %s471_s3 }
 0x145   :  { %p385_p9 = pnand %p383_p8, %p380_p7 }
 0x147   :  { %388 = shalt.err (!%p385_p9)
}
 0x148   :  { %215 = dma.vmem_to_hbm [thread:$0]  %s210_s12, 512, %s471_s3, [#allocation4], %s396_s22, %s396_s22, %s397_s23  }
 0x149   :  { %393 = dma.done.wait [#allocation4], 512  }
 0x14a   :  { %394 = vsyncadd [#allocation4], 4294966784 }
 0x14b   :  { %219 = vsyncpa [#allocation3], 1 }
 0x14c   :  { %220 = vsyncpa [#allocation6], 1 }
 0x14d   :  { %221 = vsyncpa [#allocation4], 1 }

</bundles_post_ra>
